<compile_context>
chip_gen: v6e
topology: v6e:2x2x1
jax: 0.10.0
libtpu: 0.0.40
codegen_flags: <defaults>
</compile_context>

<pallas_src>
import jax
import jax.numpy as jnp
from jax.experimental import pallas as pl
from jax.experimental.pallas import tpu as pltpu

LANE = 128  # lane-dense padded width for the action (output) dimension


def _round_up(n, m):
    return ((n + m - 1) // m) * m


def policy_net_kernel(x_ref, w1_ref, b1_ref, w2_ref, b2_ref, out_ref):
    # ---- fc1 + ReLU (MXU matmul + VPU elementwise) ----
    x = x_ref[...]                                                   # (TB, S)
    h = jnp.dot(x, w1_ref[...], preferred_element_type=jnp.float32)
    h = jnp.maximum(h + b1_ref[...], 0.0)                            # (TB, H)

    # ---- fc2 on the lane-dense padded weights ----
    logits = jnp.dot(h, w2_ref[...], preferred_element_type=jnp.float32)
    logits = logits + b2_ref[...]                                    # (TB, 128); pad lanes ~ -1e30

    # ---- numerically stable softmax over the last dim ----
    m = jnp.max(logits, axis=-1, keepdims=True)
    e = jnp.exp(logits - m)                                          # padded lanes underflow to 0
    denom = jnp.sum(e, axis=-1, keepdims=True)
    out_ref[...] = e / denom                                         # exact divide: rows sum to 1


def prepare_params(w1, b1, w2, b2):
    """One-time prep (keep OUT of the per-step hot path).

    Pads layer 2 to a lane-dense 128-wide output: padded weight columns are 0
    and padded bias lanes are -1e30, so padded logits contribute exp() == 0 to
    the softmax denominator. Must stay float32.
    """
    H, A = w2.shape
    w1p = w1.astype(jnp.float32)
    b1p = b1.astype(jnp.float32).reshape(1, -1)
    w2_p = jnp.zeros((H, LANE), jnp.float32).at[:, :A].set(w2.astype(jnp.float32))
    b2_p = jnp.full((1, LANE), -1e30, jnp.float32).at[:, :A].set(
        b2.astype(jnp.float32).reshape(-1))
    return w1p, b1p, w2_p, b2_p


def policy_net_forward(x, w1, b1, w2_p, b2_p, action_dim, *, block_b=1024, trim=True):
    """x: (B, S) f32.  w1: (S, H), b1: (1, H), w2_p: (H, 128), b2_p: (1, 128).

    Weights are pre-transposed (in_features, out_features) and layer-2 params
    are pre-padded via prepare_params(). Returns (B, action_dim) softmax probs
    when trim=True, else the raw (Bp, 128) padded tile (read lanes [:A]).
    """
    B, S = x.shape
    H = w1.shape[1]

    # Batch tile: a single block covering the whole (8-rounded) batch when B is
    # small, otherwise block_b rows per grid step (multiple of 8 sublanes).
    blk = min(_round_up(block_b, 8), _round_up(B, 8))
    nb = pl.cdiv(B, blk)
    Bp = nb * blk
    if Bp != B:
        # Avoided when B is already a multiple of blk (pad rollout buffers once
        # at allocation time for the hot path).
        x = jnp.pad(x, ((0, Bp - B), (0, 0)))

    cost = pl.CostEstimate(
        flops=2 * Bp * (S * H + H * LANE),
        transcendentals=Bp * LANE,
        bytes_accessed=4 * (Bp * S + S * H + H + H * LANE + LANE + Bp * LANE),
    )

    out_padded = pl.pallas_call(
        policy_net_kernel,
        out_shape=jax.ShapeDtypeStruct((Bp, LANE), jnp.float32),
        grid=(nb,),
        in_specs=[
            pl.BlockSpec((blk, S), lambda i: (i, 0)),     # x: streamed per grid step
            pl.BlockSpec((S, H), lambda i: (0, 0)),       # weights/biases: resident in VMEM
            pl.BlockSpec((1, H), lambda i: (0, 0)),
            pl.BlockSpec((H, LANE), lambda i: (0, 0)),
            pl.BlockSpec((1, LANE), lambda i: (0, 0)),
        ],
        out_specs=pl.BlockSpec((blk, LANE), lambda i: (i, 0)),
        compiler_params=pltpu.CompilerParams(
            dimension_semantics=("parallel",),            # shards batch across v7x's 2 TCs
        ),
        cost_estimate=cost,
    )(x, w1, b1, w2_p, b2_p)

    if trim:
        # Module-exact output. For huge rollout batches prefer trim=False and
        # have the consumer read lanes [:action_dim] to skip this extra copy.
        return out_padded[:B, :action_dim]
    return out_padded


def init_params(key, state_dim, hidden_dim, action_dim):
    """Deterministic init mimicking torch.nn.Linear default (U(-1/sqrt(fan_in), +))."""
    k1, k2, k3, k4 = jax.random.split(key, 4)
    bound1 = 1.0 / jnp.sqrt(state_dim)
    bound2 = 1.0 / jnp.sqrt(hidden_dim)
    # Stored already transposed: (in_features, out_features).
    w1 = jax.random.uniform(k1, (state_dim, hidden_dim), jnp.float32, -bound1, bound1)
    b1 = jax.random.uniform(k2, (1, hidden_dim), jnp.float32, -bound1, bound1)
    w2 = jax.random.uniform(k3, (hidden_dim, action_dim), jnp.float32, -bound2, bound2)
    b2 = jax.random.uniform(k4, (1, action_dim), jnp.float32, -bound2, bound2)
    return w1, b1, w2, b2


if __name__ == "__main__":
    # CartPole-v1: state_dim=4, action_dim=2; hidden_dim=128 as in the module.
    B, STATE_DIM, HIDDEN_DIM, ACTION_DIM = 256, 4, 128, 2

    key = jax.random.PRNGKey(0)
    kx, kp = jax.random.split(key)
    x = jax.random.normal(kx, (B, STATE_DIM), jnp.float32)
    w1, b1, w2, b2 = init_params(kp, STATE_DIM, HIDDEN_DIM, ACTION_DIM)

    # One-time parameter prep (lane padding) -- off the per-forward hot path.
    w1p, b1p, w2_p, b2_p = prepare_params(w1, b1, w2, b2)

    probs = policy_net_forward(x, w1p, b1p, w2_p, b2_p, ACTION_DIM, block_b=1024)
    probs = jax.block_until_ready(probs)

    # Reference check in plain JAX (same math as the PyTorch forward).
    h_ref = jnp.maximum(jnp.dot(x, w1, precision="highest") + b1, 0.0)
    ref = jax.nn.softmax(jnp.dot(h_ref, w2, precision="highest") + b2, axis=-1)

    assert probs.shape == (B, ACTION_DIM)
    assert jnp.allclose(probs, ref, atol=2e-3, rtol=2e-3)
    # Exact divide in the kernel -> rows sum to 1 within a few f32 ulps.
    assert jnp.allclose(jnp.sum(probs, axis=-1), 1.0, atol=1e-4)

    print("KERNEL_OK")
</pallas_src>

<mosaic_0001>
module attributes {stable_mosaic.version = 11 : i64} {
  func.func @policy_net_kernel(%arg0: i32, %arg1: memref<256x4xf32, #tpu.memory_space<vmem>>, %arg2: memref<4x128xf32, #tpu.memory_space<vmem>>, %arg3: memref<1x128xf32, #tpu.memory_space<vmem>>, %arg4: memref<128x128xf32, #tpu.memory_space<vmem>>, %arg5: memref<1x128xf32, #tpu.memory_space<vmem>>, %arg6: memref<256x128xf32, #tpu.memory_space<vmem>>) attributes {dimension_semantics = [#tpu.dimension_semantics<parallel>], iteration_bounds = array<i64: 1>, scalar_prefetch = 0 : i64, scratch_operands = 0 : i64, tpu.core_type = #tpu.core_type<tc>, window_params = [{transform_indices = @transform_0, window_bounds = array<i64: 256, 4>}, {pipeline_mode = #tpu.pipeline_mode<synchronous>, transform_indices = @transform_1, window_bounds = array<i64: 4, 128>}, {pipeline_mode = #tpu.pipeline_mode<synchronous>, transform_indices = @transform_2, window_bounds = array<i64: 1, 128>}, {pipeline_mode = #tpu.pipeline_mode<synchronous>, transform_indices = @transform_3, window_bounds = array<i64: 128, 128>}, {pipeline_mode = #tpu.pipeline_mode<synchronous>, transform_indices = @transform_4, window_bounds = array<i64: 1, 128>}, {transform_indices = @transform_5, window_bounds = array<i64: 256, 128>}]} {
    %c0 = arith.constant 0 : index
    %c0_0 = arith.constant 0 : index
    %0 = vector.load %arg1[%c0, %c0_0] : memref<256x4xf32, #tpu.memory_space<vmem>>, vector<256x4xf32>
    %c0_1 = arith.constant 0 : index
    %c0_2 = arith.constant 0 : index
    %1 = vector.load %arg2[%c0_1, %c0_2] : memref<4x128xf32, #tpu.memory_space<vmem>>, vector<4x128xf32>
    %cst = arith.constant dense<0.000000e+00> : vector<256x128xf32>
    %2 = tpu.matmul %0, %1, %cst {dimension_numbers = #tpu.dot_dimension_numbers<[1], [0], [0], [1], [0, 0, 1, 1], [], []>} : vector<256x4xf32>, vector<4x128xf32>, vector<256x128xf32> -> vector<256x128xf32>
    %c0_3 = arith.constant 0 : index
    %c0_4 = arith.constant 0 : index
    %3 = vector.load %arg3[%c0_3, %c0_4] : memref<1x128xf32, #tpu.memory_space<vmem>>, vector<1x128xf32>
    %4 = vector.broadcast %3 : vector<1x128xf32> to vector<256x128xf32>
    %5 = arith.addf %2, %4 : vector<256x128xf32>
    %cst_5 = arith.constant 0.000000e+00 : f32
    %6 = vector.broadcast %cst_5 : f32 to vector<256x128xf32>
    %7 = arith.maximumf %5, %6 : vector<256x128xf32>
    %c0_6 = arith.constant 0 : index
    %c0_7 = arith.constant 0 : index
    %8 = vector.load %arg4[%c0_6, %c0_7] : memref<128x128xf32, #tpu.memory_space<vmem>>, vector<128x128xf32>
    %cst_8 = arith.constant dense<0.000000e+00> : vector<256x128xf32>
    %9 = tpu.matmul %7, %8, %cst_8 {dimension_numbers = #tpu.dot_dimension_numbers<[1], [0], [0], [1], [0, 0, 1, 1], [], []>} : vector<256x128xf32>, vector<128x128xf32>, vector<256x128xf32> -> vector<256x128xf32>
    %c0_9 = arith.constant 0 : index
    %c0_10 = arith.constant 0 : index
    %10 = vector.load %arg5[%c0_9, %c0_10] : memref<1x128xf32, #tpu.memory_space<vmem>>, vector<1x128xf32>
    %11 = vector.broadcast %10 : vector<1x128xf32> to vector<256x128xf32>
    %12 = arith.addf %9, %11 : vector<256x128xf32>
    %cst_11 = arith.constant dense<0xFF800000> : vector<256xf32>
    %13 = vector.multi_reduction <maximumf>, %12, %cst_11 [1] : vector<256x128xf32> to vector<256xf32>
    %14 = vector.shape_cast %13 : vector<256xf32> to vector<256x1xf32>
    %15 = vector.broadcast %14 : vector<256x1xf32> to vector<256x128xf32>
    %16 = arith.subf %12, %15 : vector<256x128xf32>
    %17 = math.exp %16 : vector<256x128xf32>
    %cst_12 = arith.constant dense<0.000000e+00> : vector<256xf32>
    %18 = vector.multi_reduction <add>, %17, %cst_12 [1] : vector<256x128xf32> to vector<256xf32>
    %19 = vector.shape_cast %18 : vector<256xf32> to vector<256x1xf32>
    %20 = vector.broadcast %19 : vector<256x1xf32> to vector<256x128xf32>
    %21 = arith.divf %17, %20 : vector<256x128xf32>
    %c0_13 = arith.constant 0 : index
    %c0_14 = arith.constant 0 : index
    %22 = vector.load %arg6[%c0_13, %c0_14] : memref<256x128xf32, #tpu.memory_space<vmem>>, vector<256x128xf32>
    tpu.vector_store %arg6[%c0_13, %c0_14], %21 {strides = array<i32>} : memref<256x128xf32, #tpu.memory_space<vmem>>, vector<256x128xf32>,
    return
  }
  func.func @transform_0(%arg0: i32) -> (i32, i32) {
    %c0_i32 = arith.constant 0 : i32
    %c0_i32_0 = arith.constant 0 : i32
    return %arg0, %c0_i32 : i32, i32
  }
  func.func @transform_1(%arg0: i32) -> (i32, i32) {
    %c0_i32 = arith.constant 0 : i32
    %c0_i32_0 = arith.constant 0 : i32
    %c0_i32_1 = arith.constant 0 : i32
    return %c0_i32, %c0_i32_0 : i32, i32
  }
  func.func @transform_2(%arg0: i32) -> (i32, i32) {
    %c0_i32 = arith.constant 0 : i32
    %c0_i32_0 = arith.constant 0 : i32
    %c0_i32_1 = arith.constant 0 : i32
    return %c0_i32, %c0_i32_0 : i32, i32
  }
  func.func @transform_3(%arg0: i32) -> (i32, i32) {
    %c0_i32 = arith.constant 0 : i32
    %c0_i32_0 = arith.constant 0 : i32
    %c0_i32_1 = arith.constant 0 : i32
    return %c0_i32, %c0_i32_0 : i32, i32
  }
  func.func @transform_4(%arg0: i32) -> (i32, i32) {
    %c0_i32 = arith.constant 0 : i32
    %c0_i32_0 = arith.constant 0 : i32
    %c0_i32_1 = arith.constant 0 : i32
    return %c0_i32, %c0_i32_0 : i32, i32
  }
  func.func @transform_5(%arg0: i32) -> (i32, i32) {
    %c0_i32 = arith.constant 0 : i32
    %c0_i32_0 = arith.constant 0 : i32
    return %arg0, %c0_i32 : i32, i32
  }
}

</mosaic_0001>

<bundles_post_ra>
// kernel: tpu_custom_call.1
= control target key start
LH: loop header
LB: loop body
LE: loop exit
PB: predicated region body
PF: predicated region fallthrough
CT: control target
= control target key end

     0   :  { %vm158_vm0 = vcmask 1043456   ;;  %vm61_vm1 = vcmask 31744   ;;  %s1979_s0 = inlined_call_operand.vmem [shape: f32[256,4], index: 0, kind: input, shape index: {}]   ;;  %s1980_s1 = inlined_call_operand.vmem [shape: f32[4,128], index: 1, kind: input, shape index: {}]   ;;  %s1981_s2 = inlined_call_operand.vmem [shape: f32[1,128], index: 2, kind: input, shape index: {}]   ;;  %s1982_s3 = inlined_call_operand.vmem [shape: f32[128,128], index: 3, kind: input, shape index: {}]   ;;  %s1983_s4 = inlined_call_operand.vmem [shape: f32[1,128], index: 4, kind: input, shape index: {}]   ;;  %s1984_s5 = inlined_call_operand.hbm [shape: f32[256,128], index: 5, kind: output, shape index: {}]  }
   0x1   :  { %v53_v0 = vld [vmem:[%s1980_s1] sm:$0xf]  ;;  %v22_v2 = vld [vmem:[%s1979_s0 + $0x8] sm:$0xff]  ;;  %v23_v3 = vld [vmem:[%s1979_s0 + $0x10] sm:$0xff] }
   0x2   :  { %v21_v1 = vld [vmem:[%s1979_s0] sm:$0xff]  ;;  %1119 = vmatprep.subr.msk.mxu0 %vm158_vm0, %v53_v0  ;;  %v24_v4 = vld [vmem:[%s1979_s0 + $0x18] sm:$0xff]  ;;  %v26_v6 = vld [vmem:[%s1979_s0 + $0x28] sm:$0xff] }
   0x3   :  { %1121 = vmatprep.mubr.msk.f32.mxu0 %vm61_vm1, %v21_v1  ;;  %1120 = vmatpush3.msk.msra.mxu0 %vm158_vm0, %v53_v0  ;;  %v25_v5 = vld [vmem:[%s1979_s0 + $0x20] sm:$0xff]  ;;  %v27_v7 = vld [vmem:[%s1979_s0 + $0x30] sm:$0xff]  ;;  %v434_v8 = vld [vmem:[%s1982_s3 + $0x78] sm:$0xff] }
   0x4   :  { %1122 = vmatmul.mubr.msk.f32.vlgmr.msra.gmra.mxu0 %vm61_vm1, %v22_v2  ;;  %v433_v9 = vld [vmem:[%s1982_s3 + $0x70] sm:$0xff]  ;;  %v28_v10 = vld [vmem:[%s1979_s0 + $0x38] sm:$0xff]  ;;  %1169 = vmatprep.subr.mxu0 %v434_v8  ;;  %v29_v11 = vld [vmem:[%s1979_s0 + $0x40] sm:$0xff] }
   0x5   :  { %1124 = vmatprep.mubr.msk.f32.mxu0 %vm61_vm1, %v23_v3  ;;  %1170 = vmatpush3.msra.mxu0 %v434_v8  ;;  %v432_v12 = vld [vmem:[%s1982_s3 + $0x68] sm:$0xff]  ;;  %v431_v14 = vld [vmem:[%s1982_s3 + $0x60] sm:$0xff] }
   0x6   :  { %1249 = vmatprep.subr.mxu1 %v434_v8  ;;  %1171 = vmatprep.subr.mxu0 %v433_v9  ;;  %v30_v13 = vld [vmem:[%s1979_s0 + $0x48] sm:$0xff] }
   0x7   :  { %1265 = vmatpush3.msra.mxu1 %v434_v8  ;;  %1172 = vmatpush3.msra.mxu0 %v433_v9 }
   0x8   :  { %1125 = vmatmul.mubr.msk.f32.gmra.mxu0 %vm61_vm1, %v24_v4  ;;  %1250 = vmatprep.subr.mxu1 %v433_v9 }
   0x9   :  { %1127 = vmatprep.mubr.msk.f32.mxu0 %vm61_vm1, %v25_v5 }
   0xc   :  { %1128 = vmatmul.mubr.msk.f32.gmra.mxu0 %vm61_vm1, %v26_v6 }
   0xd   :  { %1130 = vmatprep.mubr.msk.f32.mxu0 %vm61_vm1, %v27_v7 }
  0x10   :  { %1131 = vmatmul.mubr.msk.f32.gmra.mxu0 %vm61_vm1, %v28_v10 }
  0x11   :  { %1133 = vmatprep.mubr.msk.f32.mxu0 %vm61_vm1, %v29_v11 }
  0x12   :  { %10 = vsyncpa [#allocation3], 0  ;;  %v31_v15 = vld [vmem:[%s1979_s0 + $0x50] sm:$0xff]  ;;  %1173 = vmatprep.subr.mxu0 %v432_v12  ;;  %1266 = vmatpush3.msra.mxu1 %v433_v9  ;;  %v430_v16 = vld [vmem:[%s1982_s3 + $0x58] sm:$0xff] }
  0x13   :  { %1174 = vmatpush3.msra.mxu0 %v432_v12  ;;  %1251 = vmatprep.subr.mxu1 %v432_v12  ;;  %v32_v17 = vld [vmem:[%s1979_s0 + $0x58] sm:$0xff]  ;;  %v429_v18 = vld [vmem:[%s1982_s3 + $0x50] sm:$0xff]  ;;  %v33_v19 = vld [vmem:[%s1979_s0 + $0x60] sm:$0xff] }
  0x14   :  { %1134 = vmatmul.mubr.msk.f32.gmra.mxu0 %vm61_vm1, %v30_v13  ;;  %1175 = vmatprep.subr.mxu0 %v431_v14  ;;  %v428_v20 = vld [vmem:[%s1982_s3 + $0x48] sm:$0xff]  ;;  %v427_v22 = vld [vmem:[%s1982_s3 + $0x40] sm:$0xff]  ;;  %v35_v23 = vld [vmem:[%s1979_s0 + $0x70] sm:$0xff] }
  0x15   :  { %1136 = vmatprep.mubr.msk.f32.mxu0 %vm61_vm1, %v31_v15  ;;  %1176 = vmatpush3.msra.mxu0 %v431_v14  ;;  %v34_v21 = vld [vmem:[%s1979_s0 + $0x68] sm:$0xff]  ;;  %v426_v24 = vld [vmem:[%s1982_s3 + $0x38] sm:$0xff]  ;;  %v425_v26 = vld [vmem:[%s1982_s3 + $0x30] sm:$0xff] }
  0x16   :  { %1177 = vmatprep.subr.mxu0 %v430_v16  ;;  %1267 = vmatpush3.msra.mxu1 %v432_v12  ;;  %v36_v25 = vld [vmem:[%s1979_s0 + $0x78] sm:$0xff]  ;;  %v37_v27 = vld [vmem:[%s1979_s0 + $0x80] sm:$0xff]  ;;  %v424_v28 = vld [vmem:[%s1982_s3 + $0x28] sm:$0xff] }
  0x17   :  { %1178 = vmatpush3.msra.mxu0 %v430_v16  ;;  %1252 = vmatprep.subr.mxu1 %v431_v14  ;;  %v38_v29 = vld [vmem:[%s1979_s0 + $0x88] sm:$0xff]  ;;  %v423_v30 = vld [vmem:[%s1982_s3 + $0x20] sm:$0xff]  ;;  %v39_v31 = vld [vmem:[%s1979_s0 + $0x90] sm:$0xff] }
  0x18   :  { %1137 = vmatmul.mubr.msk.f32.gmra.mxu0 %vm61_vm1, %v32_v17  ;;  %1179 = vmatprep.subr.mxu0 %v429_v18  ;;  %v422_v32 = vld [vmem:[%s1982_s3 + $0x18] sm:$0xff]  ;;  %v421_v34 = vld [vmem:[%s1982_s3 + $0x10] sm:$0xff]  ;;  %v41_v35 = vld [vmem:[%s1979_s0 + $0xa0] sm:$0xff] }
  0x19   :  { %1139 = vmatprep.mubr.msk.f32.mxu0 %vm61_vm1, %v33_v19  ;;  %1180 = vmatpush3.msra.mxu0 %v429_v18  ;;  %v40_v33 = vld [vmem:[%s1979_s0 + $0x98] sm:$0xff]  ;;  %v420_v36 = vld [vmem:[%s1982_s3 + $0x8] sm:$0xff]  ;;  %v43_v38 = vld [vmem:[%s1979_s0 + $0xb0] sm:$0xff] }
  0x1a   :  { %1181 = vmatprep.subr.mxu0 %v428_v20  ;;  %1268 = vmatpush3.msra.mxu1 %v431_v14  ;;  %v42_v37 = vld [vmem:[%s1979_s0 + $0xa8] sm:$0xff]  ;;  %v44_v39 = vld [vmem:[%s1979_s0 + $0xb8] sm:$0xff]  ;;  %v45_v40 = vld [vmem:[%s1979_s0 + $0xc0] sm:$0xff] }
  0x1b   :  { %1182 = vmatpush3.msra.mxu0 %v428_v20  ;;  %1253 = vmatprep.subr.mxu1 %v430_v16  ;;  %v46_v41 = vld [vmem:[%s1979_s0 + $0xc8] sm:$0xff]  ;;  %v47_v42 = vld [vmem:[%s1979_s0 + $0xd0] sm:$0xff]  ;;  %v48_v43 = vld [vmem:[%s1979_s0 + $0xd8] sm:$0xff] }
  0x1c   :  { %1140 = vmatmul.mubr.msk.f32.gmra.mxu0 %vm61_vm1, %v34_v21  ;;  %1183 = vmatprep.subr.mxu0 %v427_v22  ;;  %v49_v44 = vld [vmem:[%s1979_s0 + $0xe0] sm:$0xff]  ;;  %v50_v45 = vld [vmem:[%s1979_s0 + $0xe8] sm:$0xff]  ;;  %v51_v46 = vld [vmem:[%s1979_s0 + $0xf0] sm:$0xff] }
  0x1d   :  { %1142 = vmatprep.mubr.msk.f32.mxu0 %vm61_vm1, %v35_v23  ;;  %1184 = vmatpush3.msra.mxu0 %v427_v22  ;;  %v52_v47 = vld [vmem:[%s1979_s0 + $0xf8] sm:$0xff]  ;;  %v419_v48 = vld [vmem:[%s1982_s3] sm:$0xff]  ;;  %s1434_s3 = smov [#allocation2]  }
  0x1e   :  { %1185 = vmatprep.subr.mxu0 %v426_v24  ;;  %1269 = vmatpush3.msra.mxu1 %v430_v16  ;;  %v1649_v49 = vld [vmem:[%s1981_s2] ss:$0 sm:$0xff] }
  0x1f   :  { %1186 = vmatpush3.msra.mxu0 %v426_v24  ;;  %1254 = vmatprep.subr.mxu1 %v429_v18 }
  0x20   :  { %1143 = vmatmul.mubr.msk.f32.gmra.mxu0 %vm61_vm1, %v36_v25  ;;  %1187 = vmatprep.subr.mxu0 %v425_v26 }
  0x21   :  { %1145 = vmatprep.mubr.msk.f32.mxu0 %vm61_vm1, %v37_v27  ;;  %1188 = vmatpush3.msra.mxu0 %v425_v26 }
  0x22   :  { %1189 = vmatprep.subr.mxu0 %v424_v28  ;;  %1270 = vmatpush3.msra.mxu1 %v429_v18 }
  0x23   :  { %1190 = vmatpush3.msra.mxu0 %v424_v28  ;;  %1255 = vmatprep.subr.mxu1 %v428_v20 }
  0x24   :  { %1146 = vmatmul.mubr.msk.f32.gmra.mxu0 %vm61_vm1, %v38_v29  ;;  %1191 = vmatprep.subr.mxu0 %v423_v30 }
  0x25   :  { %1148 = vmatprep.mubr.msk.f32.mxu0 %vm61_vm1, %v39_v31  ;;  %1192 = vmatpush3.msra.mxu0 %v423_v30 }
  0x26   :  { %1193 = vmatprep.subr.mxu0 %v422_v32  ;;  %1271 = vmatpush3.msra.mxu1 %v428_v20 }
  0x27   :  { %1194 = vmatpush3.msra.mxu0 %v422_v32  ;;  %1256 = vmatprep.subr.mxu1 %v427_v22 }
  0x28   :  { %1149 = vmatmul.mubr.msk.f32.gmra.mxu0 %vm61_vm1, %v40_v33  ;;  %1195 = vmatprep.subr.mxu0 %v421_v34 }
  0x29   :  { %1151 = vmatprep.mubr.msk.f32.mxu0 %vm61_vm1, %v41_v35  ;;  %1196 = vmatpush3.msra.mxu0 %v421_v34 }
  0x2a   :  { %1197 = vmatprep.subr.mxu0 %v420_v36  ;;  %1272 = vmatpush3.msra.mxu1 %v427_v22 }
  0x2b   :  { %1198 = vmatpush3.msra.mxu0 %v420_v36  ;;  %1257 = vmatprep.subr.mxu1 %v426_v24 }
  0x2c   :  { %1152 = vmatmul.mubr.msk.f32.gmra.mxu0 %vm61_vm1, %v42_v37  ;;  %1273 = vmatpush3.msra.mxu1 %v426_v24 }
  0x2d   :  { %1154 = vmatprep.mubr.msk.f32.mxu0 %vm61_vm1, %v43_v38  ;;  %1258 = vmatprep.subr.mxu1 %v425_v26 }
  0x2e   :  { %1274 = vmatpush3.msra.mxu1 %v425_v26  ;;  %1199 = vmatprep.subr.mxu0 %v419_v48 }
  0x2f   :  { %1259 = vmatprep.subr.mxu1 %v424_v28  ;;  %1200 = vmatpush3.msra.mxu0 %v419_v48 }
  0x30   :  { %1155 = vmatmul.mubr.msk.f32.gmra.mxu0 %vm61_vm1, %v44_v39  ;;  %1275 = vmatpush3.msra.mxu1 %v424_v28 }
  0x31   :  { %1157 = vmatprep.mubr.msk.f32.mxu0 %vm61_vm1, %v45_v40  ;;  %1260 = vmatprep.subr.mxu1 %v423_v30 }
  0x32   :  { %1276 = vmatpush3.msra.mxu1 %v423_v30 }
  0x33   :  { %1261 = vmatprep.subr.mxu1 %v422_v32 }
  0x34   :  { %1158 = vmatmul.mubr.msk.f32.gmra.mxu0 %vm61_vm1, %v46_v41  ;;  %1277 = vmatpush3.msra.mxu1 %v422_v32 }
  0x35   :  { %1160 = vmatprep.mubr.msk.f32.mxu0 %vm61_vm1, %v47_v42  ;;  %1262 = vmatprep.subr.mxu1 %v421_v34 }
  0x36   :  { %1278 = vmatpush3.msra.mxu1 %v421_v34 }
  0x37   :  { %1263 = vmatprep.subr.mxu1 %v420_v36 }
  0x38   :  { %1161 = vmatmul.mubr.msk.f32.gmra.mxu0 %vm61_vm1, %v48_v43  ;;  %1279 = vmatpush3.msra.mxu1 %v420_v36 }
  0x39   :  { %1163 = vmatprep.mubr.msk.f32.mxu0 %vm61_vm1, %v49_v44  ;;  %1264 = vmatprep.subr.mxu1 %v419_v48 }
  0x3a   :  { %1280 = vmatpush3.msra.mxu1 %v419_v48 }
  0x3c   :  { %1164 = vmatmul.mubr.msk.f32.gmra.mxu0 %vm61_vm1, %v50_v45 }
  0x3d   :  { %1166 = vmatprep.mubr.msk.f32.mxu0 %vm61_vm1, %v51_v46 }
  0x40   :  { %1167 = vmatmul.mubr.msk.f32.gmra.mxu0 %vm61_vm1, %v52_v47 }
  0xc4   :  { %v1123_v50 = vpop.f32.mrf.mxu0 }
  0xc5   :  { %v234_v51 = vadd.f32 %v1123_v50, %v1649_v49 }
  0xc6   :  { %v228_v52 = vpop.f32.mrf.mxu0 }
  0xc7   :  { %v229_v53 = vadd.f32 %v1649_v49, %v228_v52  ;;  %v388_v56 = vmax.f32 %v234_v51, 0.0 }
  0xc8   :  { %v1126_v54 = vpop.f32.mrf.mxu0 }
  0xc9   :  { %v387_v55 = vmax.f32 %v229_v53, 0.0  ;;  %v244_v57 = vadd.f32 %v1126_v54, %v1649_v49 }
  0xca   :  { %v238_v58 = vpop.f32.mrf.mxu0 }
  0xcb   :  { %v239_v59 = vadd.f32 %v1649_v49, %v238_v58  ;;  %1201 = vmatprep.mubr.f32.mxu0 %v387_v55  ;;  %v390_v63 = vmax.f32 %v244_v57, 0.0 }
  0xcc   :  { %v1129_v60 = vpop.f32.mrf.mxu0  ;;  %1202 = vmatmul.mubr.f32.vlgmr.msra.gmra.mxu0 %v388_v56 }
  0xcd   :  { %v389_v61 = vmax.f32 %v239_v59, 0.0  ;;  %v254_v62 = vadd.f32 %v1129_v60, %v1649_v49 }
  0xce   :  { %v248_v0 = vpop.f32.mrf.mxu0 }
  0xcf   :  { %v249_v1 = vadd.f32 %v1649_v49, %v248_v0  ;;  %1204 = vmatprep.mubr.f32.mxu0 %v389_v61  ;;  %v392_v2 = vmax.f32 %v254_v62, 0.0 }
  0xd0   :  { %v1132_v3 = vpop.f32.mrf.mxu0  ;;  %1205 = vmatmul.mubr.f32.gmra.mxu0 %v390_v63 }
  0xd1   :  { %v391_v4 = vmax.f32 %v249_v1, 0.0  ;;  %v264_v5 = vadd.f32 %v1132_v3, %v1649_v49 }
  0xd2   :  { %v258_v6 = vpop.f32.mrf.mxu0 }
  0xd3   :  { %1207 = vmatprep.mubr.f32.mxu0 %v391_v4  ;;  %v259_v7 = vadd.f32 %v1649_v49, %v258_v6  ;;  %v394_v8 = vmax.f32 %v264_v5, 0.0 }
  0xd4   :  { %v1135_v9 = vpop.f32.mrf.mxu0  ;;  %1208 = vmatmul.mubr.f32.gmra.mxu0 %v392_v2 }
  0xd5   :  { %v274_v10 = vadd.f32 %v1135_v9, %v1649_v49  ;;  %v393_v11 = vmax.f32 %v259_v7, 0.0 }
  0xd6   :  { %v268_v12 = vpop.f32.mrf.mxu0 }
  0xd7   :  { %v269_v13 = vadd.f32 %v1649_v49, %v268_v12  ;;  %1210 = vmatprep.mubr.f32.mxu1 %v393_v11  ;;  %v396_v14 = vmax.f32 %v274_v10, 0.0 }
  0xd8   :  { %v1138_v15 = vpop.f32.mrf.mxu0  ;;  %1211 = vmatmul.mubr.f32.vlgmr.msra.gmra.mxu1 %v394_v8 }
  0xd9   :  { %v395_v16 = vmax.f32 %v269_v13, 0.0  ;;  %v284_v17 = vadd.f32 %v1138_v15, %v1649_v49 }
  0xda   :  { %v278_v18 = vpop.f32.mrf.mxu0 }
  0xdb   :  { %v279_v19 = vadd.f32 %v1649_v49, %v278_v18  ;;  %1213 = vmatprep.mubr.f32.mxu1 %v395_v16  ;;  %v398_v20 = vmax.f32 %v284_v17, 0.0 }
  0xdc   :  { %v1141_v21 = vpop.f32.mrf.mxu0  ;;  %1214 = vmatmul.mubr.f32.gmra.mxu1 %v396_v14 }
  0xdd   :  { %v397_v22 = vmax.f32 %v279_v19, 0.0  ;;  %v294_v23 = vadd.f32 %v1141_v21, %v1649_v49  ;;  %v1686_v19 = vld [vmem:[%s1983_s4] ss:$0 sm:$0xff]  ;;  %s992_s4 = sshll.u32 %s1434_s3, 4  ;;  %s993_s4 = int_to_ptr.vmem [resolvable:$true] %s992_s4 }
  0xde   :  { %v288_v24 = vpop.f32.mrf.mxu0  ;;  %s1412_s14 = scalar_lea.vmem %s993_s4, 4096  ;;  %p1417_p1 = scmp.lt.s32.totalorder %s993_s4, %s993_s4 }
  0xdf   :  { %v289_v25 = vadd.f32 %v1649_v49, %v288_v24  ;;  %1216 = vmatprep.mubr.f32.mxu1 %v397_v22  ;;  %v400_v26 = vmax.f32 %v294_v23, 0.0  ;;  %p1413_p0 = scmp.ne.s32.totalorder %s993_s4, %s1412_s14  ;;  %p1418_p2 = scmp.lt.s32.totalorder %s1412_s14, %s1412_s14 }
  0xe0   :  { %v1144_v27 = vpop.f32.mrf.mxu0  ;;  %1217 = vmatmul.mubr.f32.gmra.mxu1 %v398_v20 }
  0xe1   :  { %v399_v28 = vmax.f32 %v289_v25, 0.0  ;;  %v304_v29 = vadd.f32 %v1144_v27, %v1649_v49  ;;  %p1419_p3 = por %p1418_p2, %p1417_p1 }
  0xe2   :  { %v298_v30 = vpop.f32.mrf.mxu0 }
  0xe3   :  { %v299_v31 = vadd.f32 %v1649_v49, %v298_v30  ;;  %1219 = vmatprep.mubr.f32.mxu1 %v399_v28  ;;  %v402_v32 = vmax.f32 %v304_v29, 0.0  ;;  %p1420_p4 = pnand %p1419_p3, %p1413_p0 }
  0xe4   :  { %v1147_v33 = vpop.f32.mrf.mxu0  ;;  %1220 = vmatmul.mubr.f32.gmra.mxu1 %v400_v26 }
  0xe5   :  { %v401_v34 = vmax.f32 %v299_v31, 0.0  ;;  %v314_v35 = vadd.f32 %v1147_v33, %v1649_v49 }
  0xe6   :  { %v308_v36 = vpop.f32.mrf.mxu0 }
  0xe7   :  { %v309_v37 = vadd.f32 %v1649_v49, %v308_v36  ;;  %1222 = vmatprep.mubr.f32.mxu1 %v401_v34  ;;  %v404_v38 = vmax.f32 %v314_v35, 0.0 }
  0xe8   :  { %v1150_v39 = vpop.f32.mrf.mxu0  ;;  %1223 = vmatmul.mubr.f32.gmra.mxu1 %v402_v32 }
  0xe9   :  { %v403_v40 = vmax.f32 %v309_v37, 0.0  ;;  %v324_v41 = vadd.f32 %v1150_v39, %v1649_v49 }
  0xea   :  { %v318_v42 = vpop.f32.mrf.mxu0 }
  0xeb   :  { %v319_v43 = vadd.f32 %v1649_v49, %v318_v42  ;;  %1225 = vmatprep.mubr.f32.mxu1 %v403_v40  ;;  %v406_v44 = vmax.f32 %v324_v41, 0.0 }
  0xec   :  { %v1153_v45 = vpop.f32.mrf.mxu0  ;;  %1226 = vmatmul.mubr.f32.gmra.mxu1 %v404_v38 }
  0xed   :  { %v405_v46 = vmax.f32 %v319_v43, 0.0  ;;  %v334_v47 = vadd.f32 %v1153_v45, %v1649_v49 }
  0xee   :  { %v328_v48 = vpop.f32.mrf.mxu0 }
  0xef   :  { %v329_v50 = vadd.f32 %v1649_v49, %v328_v48  ;;  %1228 = vmatprep.mubr.f32.mxu1 %v405_v46  ;;  %v408_v51 = vmax.f32 %v334_v47, 0.0 }
  0xf0   :  { %v1156_v52 = vpop.f32.mrf.mxu0  ;;  %1229 = vmatmul.mubr.f32.gmra.mxu1 %v406_v44 }
  0xf1   :  { %v407_v53 = vmax.f32 %v329_v50, 0.0  ;;  %v344_v54 = vadd.f32 %v1156_v52, %v1649_v49 }
  0xf2   :  { %v338_v55 = vpop.f32.mrf.mxu0 }
  0xf3   :  { %v339_v56 = vadd.f32 %v1649_v49, %v338_v55  ;;  %1231 = vmatprep.mubr.f32.mxu1 %v407_v53  ;;  %v410_v57 = vmax.f32 %v344_v54, 0.0 }
  0xf4   :  { %v1159_v58 = vpop.f32.mrf.mxu0  ;;  %1232 = vmatmul.mubr.f32.gmra.mxu1 %v408_v51 }
  0xf5   :  { %v409_v59 = vmax.f32 %v339_v56, 0.0  ;;  %v354_v60 = vadd.f32 %v1159_v58, %v1649_v49 }
  0xf6   :  { %v348_v61 = vpop.f32.mrf.mxu0 }
  0xf7   :  { %v349_v62 = vadd.f32 %v1649_v49, %v348_v61  ;;  %1234 = vmatprep.mubr.f32.mxu1 %v409_v59  ;;  %v412_v63 = vmax.f32 %v354_v60, 0.0 }
  0xf8   :  { %v1162_v0 = vpop.f32.mrf.mxu0  ;;  %1235 = vmatmul.mubr.f32.gmra.mxu1 %v410_v57 }
  0xf9   :  { %v411_v1 = vmax.f32 %v349_v62, 0.0  ;;  %v364_v2 = vadd.f32 %v1162_v0, %v1649_v49 }
  0xfa   :  { %v358_v3 = vpop.f32.mrf.mxu0 }
  0xfb   :  { %v359_v4 = vadd.f32 %v1649_v49, %v358_v3  ;;  %1237 = vmatprep.mubr.f32.mxu1 %v411_v1  ;;  %v414_v5 = vmax.f32 %v364_v2, 0.0 }
  0xfc   :  { %v1165_v6 = vpop.f32.mrf.mxu0  ;;  %1238 = vmatmul.mubr.f32.gmra.mxu1 %v412_v63 }
  0xfd   :  { %v413_v7 = vmax.f32 %v359_v4, 0.0  ;;  %v374_v8 = vadd.f32 %v1165_v6, %v1649_v49 }
  0xfe   :  { %v368_v9 = vpop.f32.mrf.mxu0 }
  0xff   :  { %v369_v10 = vadd.f32 %v1649_v49, %v368_v9  ;;  %1240 = vmatprep.mubr.f32.mxu1 %v413_v7  ;;  %v416_v11 = vmax.f32 %v374_v8, 0.0 }
 0x100   :  { %v1168_v12 = vpop.f32.mrf.mxu0  ;;  %1241 = vmatmul.mubr.f32.gmra.mxu1 %v414_v5 }
 0x101   :  { %v415_v13 = vmax.f32 %v369_v10, 0.0  ;;  %v384_v14 = vadd.f32 %v1168_v12, %v1649_v49 }
 0x102   :  { %v378_v15 = vpop.f32.mrf.mxu0 }
 0x103   :  { %v379_v16 = vadd.f32 %v1649_v49, %v378_v15  ;;  %1243 = vmatprep.mubr.f32.mxu1 %v415_v13  ;;  %v418_v17 = vmax.f32 %v384_v14, 0.0 }
 0x104   :  { %1244 = vmatmul.mubr.f32.gmra.mxu1 %v416_v11 }
 0x105   :  { %v417_v18 = vmax.f32 %v379_v16, 0.0 }
 0x107   :  { %1246 = vmatprep.mubr.f32.mxu1 %v417_v18 }
 0x108   :  { %1247 = vmatmul.mubr.f32.gmra.mxu1 %v418_v17 }
 0x18c   :  { %v1203_v20 = vpop.f32.mrf.mxu0 }
 0x18d   :  { %v1689_v21 = vadd.f32 %v1203_v20, %v1686_v19 }
 0x18e   :  { %v508_v22 = vpop.f32.mrf.mxu0 }
 0x18f   :  { %669 = vmax.xlane.f32.xlu0 %v1689_v21  ;;  %v1693_v49 = vadd.f32 %v1686_v19, %v508_v22 }
 0x190   :  { %v1206_v23 = vpop.f32.mrf.mxu0 }
 0x191   :  { %v1696_v24 = vadd.f32 %v1206_v23, %v1686_v19 }
 0x192   :  { %v518_v25 = vpop.f32.mrf.mxu0 }
 0x193   :  { %673 = vmax.xlane.f32.xlu1 %v1696_v24  ;;  %667 = vmax.xlane.f32.xlu0 %v1693_v49  ;;  %v1701_v27 = vadd.f32 %v1686_v19, %v518_v25 }
 0x194   :  { %v1209_v26 = vpop.f32.mrf.mxu0 }
 0x195   :  { %v1708_v31 = vadd.f32 %v1209_v26, %v1686_v19 }
 0x196   :  { %v528_v28 = vpop.f32.mrf.mxu0 }
 0x197   :  { %v1704_v29 = vadd.f32 %v1686_v19, %v528_v28  ;;  %671 = vmax.xlane.f32.xlu1 %v1701_v27 }
 0x198   :  { %v1212_v30 = vpop.f32.mrf.mxu1 }
 0x199   :  { %675 = vmax.xlane.f32.xlu0 %v1704_v29  ;;  %v1716_v35 = vadd.f32 %v1212_v30, %v1686_v19 }
 0x19a   :  { %v538_v32 = vpop.f32.mrf.mxu1 }
 0x19b   :  { %v1712_v33 = vadd.f32 %v1686_v19, %v538_v32  ;;  %677 = vmax.xlane.f32.xlu1 %v1708_v31 }
 0x19c   :  { %v1215_v34 = vpop.f32.mrf.mxu1 }
 0x19d   :  { %679 = vmax.xlane.f32.xlu0 %v1712_v33  ;;  %v1724_v39 = vadd.f32 %v1215_v34, %v1686_v19 }
 0x19e   :  { %v548_v36 = vpop.f32.mrf.mxu1 }
 0x19f   :  { %v1720_v37 = vadd.f32 %v1686_v19, %v548_v36  ;;  %681 = vmax.xlane.f32.xlu1 %v1716_v35 }
 0x1a0   :  { %v1218_v38 = vpop.f32.mrf.mxu1 }
 0x1a1   :  { %683 = vmax.xlane.f32.xlu0 %v1720_v37  ;;  %v1732_v43 = vadd.f32 %v1218_v38, %v1686_v19 }
 0x1a2   :  { %v558_v40 = vpop.f32.mrf.mxu1 }
 0x1a3   :  { %v1728_v41 = vadd.f32 %v1686_v19, %v558_v40  ;;  %685 = vmax.xlane.f32.xlu1 %v1724_v39 }
 0x1a4   :  { %v1221_v42 = vpop.f32.mrf.mxu1 }
 0x1a5   :  { %687 = vmax.xlane.f32.xlu0 %v1728_v41  ;;  %v1740_v47 = vadd.f32 %v1221_v42, %v1686_v19 }
 0x1a6   :  { %v568_v44 = vpop.f32.mrf.mxu1 }
 0x1a7   :  { %v1736_v45 = vadd.f32 %v1686_v19, %v568_v44  ;;  %689 = vmax.xlane.f32.xlu1 %v1732_v43 }
 0x1a8   :  { %v1224_v46 = vpop.f32.mrf.mxu1 }
 0x1a9   :  { %691 = vmax.xlane.f32.xlu0 %v1736_v45  ;;  %v1748_v52 = vadd.f32 %v1224_v46, %v1686_v19 }
 0x1aa   :  { %v578_v48 = vpop.f32.mrf.mxu1 }
 0x1ab   :  { %v1744_v50 = vadd.f32 %v1686_v19, %v578_v48  ;;  %693 = vmax.xlane.f32.xlu1 %v1740_v47 }
 0x1ac   :  { %v1227_v51 = vpop.f32.mrf.mxu1 }
 0x1ad   :  { %695 = vmax.xlane.f32.xlu0 %v1744_v50  ;;  %v1756_v56 = vadd.f32 %v1227_v51, %v1686_v19 }
 0x1ae   :  { %v588_v53 = vpop.f32.mrf.mxu1 }
 0x1af   :  { %v1752_v54 = vadd.f32 %v1686_v19, %v588_v53  ;;  %697 = vmax.xlane.f32.xlu1 %v1748_v52 }
 0x1b0   :  { %v1230_v55 = vpop.f32.mrf.mxu1 }
 0x1b1   :  { %699 = vmax.xlane.f32.xlu0 %v1752_v54  ;;  %v1764_v60 = vadd.f32 %v1230_v55, %v1686_v19 }
 0x1b2   :  { %v598_v57 = vpop.f32.mrf.mxu1 }
 0x1b3   :  { %v1760_v58 = vadd.f32 %v1686_v19, %v598_v57  ;;  %701 = vmax.xlane.f32.xlu1 %v1756_v56 }
 0x1b4   :  { %v1233_v59 = vpop.f32.mrf.mxu1 }
 0x1b5   :  { %703 = vmax.xlane.f32.xlu0 %v1760_v58  ;;  %v1772_v0 = vadd.f32 %v1233_v59, %v1686_v19 }
 0x1b6   :  { %v608_v61 = vpop.f32.mrf.mxu1 }
 0x1b7   :  { %v1768_v62 = vadd.f32 %v1686_v19, %v608_v61  ;;  %705 = vmax.xlane.f32.xlu1 %v1764_v60 }
 0x1b8   :  { %v1236_v63 = vpop.f32.mrf.mxu1 }
 0x1b9   :  { %707 = vmax.xlane.f32.xlu0 %v1768_v62  ;;  %v1780_v4 = vadd.f32 %v1236_v63, %v1686_v19 }
 0x1ba   :  { %v618_v1 = vpop.f32.mrf.mxu1 }
 0x1bb   :  { %v1776_v2 = vadd.f32 %v1686_v19, %v618_v1  ;;  %709 = vmax.xlane.f32.xlu1 %v1772_v0 }
 0x1bc   :  { %v1239_v3 = vpop.f32.mrf.mxu1 }
 0x1bd   :  { %711 = vmax.xlane.f32.xlu0 %v1776_v2  ;;  %v1788_v8 = vadd.f32 %v1239_v3, %v1686_v19 }
 0x1be   :  { %v628_v5 = vpop.f32.mrf.mxu1 }
 0x1bf   :  { %v1784_v6 = vadd.f32 %v1686_v19, %v628_v5  ;;  %713 = vmax.xlane.f32.xlu1 %v1780_v4 }
 0x1c0   :  { %v1242_v7 = vpop.f32.mrf.mxu1 }
 0x1c1   :  { %715 = vmax.xlane.f32.xlu0 %v1784_v6  ;;  %v1796_v12 = vadd.f32 %v1242_v7, %v1686_v19 }
 0x1c2   :  { %v638_v9 = vpop.f32.mrf.mxu1 }
 0x1c3   :  { %v1792_v10 = vadd.f32 %v1686_v19, %v638_v9  ;;  %717 = vmax.xlane.f32.xlu1 %v1788_v8 }
 0x1c4   :  { %v1245_v11 = vpop.f32.mrf.mxu1 }
 0x1c5   :  { %719 = vmax.xlane.f32.xlu0 %v1792_v10  ;;  %v1804_v16 = vadd.f32 %v1245_v11, %v1686_v19 }
 0x1c6   :  { %v648_v13 = vpop.f32.mrf.mxu1 }
 0x1c7   :  { %v1800_v14 = vadd.f32 %v1686_v19, %v648_v13  ;;  %721 = vmax.xlane.f32.xlu1 %v1796_v12 }
 0x1c8   :  { %v1248_v15 = vpop.f32.mrf.mxu1 }
 0x1c9   :  { %723 = vmax.xlane.f32.xlu0 %v1800_v14  ;;  %v1812_v20 = vadd.f32 %v1248_v15, %v1686_v19 }
 0x1ca   :  { %v658_v17 = vpop.f32.mrf.mxu1 }
 0x1cb   :  { %v1808_v18 = vadd.f32 %v1686_v19, %v658_v17  ;;  %725 = vmax.xlane.f32.xlu1 %v1804_v16 }
 0x1cd   :  { %727 = vmax.xlane.f32.xlu0 %v1808_v18 }
 0x1cf   :  { %729 = vmax.xlane.f32.xlu1 %v1812_v20 }
 0x218   :  { %v670_v22 = vpop.xlane.xlu0 %669 }
 0x219   :  { %v732_v23 = vsub.f32 %v1689_v21, %v670_v22 }
 0x21b   :  { %v765_v25 = vmul.f32 1.442695, %v732_v23 }
 0x21c   :  { %v674_v26 = vpop.xlane.xlu1 %673  ;;  %v668_v28 = vpop.xlane.xlu0 %667 }
 0x21d   :  { %1284 = vpow2.f32 %v765_v25  ;;  %v734_v30 = vsub.f32 %v1696_v24, %v674_v26  ;;  %v731_v32 = vsub.f32 %v1693_v49, %v668_v28 }
 0x21f   :  { %v769_v34 = vmul.f32 1.442695, %v734_v30  ;;  %v763_v36 = vmul.f32 1.442695, %v731_v32 }
 0x220   :  { %v672_v38 = vpop.xlane.xlu1 %671 }
 0x221   :  { %1286 = vpow2.f32 %v769_v34  ;;  %v733_v19 = vsub.f32 %v1701_v27, %v672_v38 }
 0x222   :  { %1288 = vpow2.f32 %v763_v36  ;;  %v676_v40 = vpop.xlane.xlu0 %675 }
 0x223   :  { %v767_v42 = vmul.f32 1.442695, %v733_v19  ;;  %v735_v44 = vsub.f32 %v1704_v29, %v676_v40 }
 0x224   :  { %v678_v21 = vpop.xlane.xlu1 %677 }
 0x225   :  { %1290 = vpow2.f32 %v767_v42  ;;  %v736_v46 = vsub.f32 %v1708_v31, %v678_v21  ;;  %v771_v48 = vmul.f32 1.442695, %v735_v44 }
 0x226   :  { %v680_v51 = vpop.xlane.xlu0 %679 }
 0x227   :  { %v773_v24 = vmul.f32 1.442695, %v736_v46  ;;  %v737_v49 = vsub.f32 %v1712_v33, %v680_v51 }
 0x228   :  { %v682_v53 = vpop.xlane.xlu1 %681 }
 0x229   :  { %1292 = vpow2.f32 %v773_v24  ;;  %v738_v55 = vsub.f32 %v1716_v35, %v682_v53  ;;  %v775_v27 = vmul.f32 1.442695, %v737_v49 }
 0x22a   :  { %v1824_v57 = vpop.eup %1284  ;;  %1294 = vpow2.f32 %v771_v48  ;;  %v684_v59 = vpop.xlane.xlu0 %683 }
 0x22b   :  { %v777_v61 = vmul.f32 1.442695, %v738_v55  ;;  %v739_v29 = vsub.f32 %v1720_v37, %v684_v59  ;;  %829 = vadd.xlane.f32.xlu1 %v1824_v57 }
 0x22c   :  { %v686_v31 = vpop.xlane.xlu1 %685 }
 0x22d   :  { %1296 = vpow2.f32 %v777_v61  ;;  %v740_v63 = vsub.f32 %v1724_v39, %v686_v31  ;;  %v779_v33 = vmul.f32 1.442695, %v739_v29 }
 0x22e   :  { %v1829_v1 = vpop.eup %1286  ;;  %1298 = vpow2.f32 %v775_v27  ;;  %v688_v3 = vpop.xlane.xlu0 %687 }
 0x22f   :  { %v1831_v35 = vpop.eup %1288  ;;  %v781_v5 = vmul.f32 1.442695, %v740_v63  ;;  %v741_v7 = vsub.f32 %v1728_v41, %v688_v3  ;;  %833 = vadd.xlane.f32.xlu1 %v1829_v1 }
 0x230   :  { %827 = vadd.xlane.f32.xlu0 %v1831_v35  ;;  %v690_v37 = vpop.xlane.xlu1 %689 }
 0x231   :  { %1300 = vpow2.f32 %v781_v5  ;;  %v742_v9 = vsub.f32 %v1732_v43, %v690_v37  ;;  %v783_v39 = vmul.f32 1.442695, %v741_v7 }
 0x232   :  { %v1837_v11 = vpop.eup %1290  ;;  %1302 = vpow2.f32 %v779_v33  ;;  %v692_v13 = vpop.xlane.xlu0 %691 }
 0x233   :  { %v785_v15 = vmul.f32 1.442695, %v742_v9  ;;  %v743_v17 = vsub.f32 %v1736_v45, %v692_v13 }
 0x234   :  { %831 = vadd.xlane.f32.xlu0 %v1837_v11  ;;  %v694_v22 = vpop.xlane.xlu1 %693 }
 0x235   :  { %1304 = vpow2.f32 %v785_v15  ;;  %v744_v41 = vsub.f32 %v1740_v47, %v694_v22  ;;  %v787_v25 = vmul.f32 1.442695, %v743_v17 }
 0x236   :  { %v1842_v23 = vpop.eup %1292  ;;  %1306 = vpow2.f32 %v783_v39  ;;  %v696_v26 = vpop.xlane.xlu0 %695 }
 0x237   :  { %v1844_v43 = vpop.eup %1294  ;;  %v789_v28 = vmul.f32 1.442695, %v744_v41  ;;  %v745_v30 = vsub.f32 %v1744_v50, %v696_v26  ;;  %837 = vadd.xlane.f32.xlu1 %v1842_v23 }
 0x238   :  { %835 = vadd.xlane.f32.xlu0 %v1844_v43  ;;  %v698_v45 = vpop.xlane.xlu1 %697 }
 0x239   :  { %1308 = vpow2.f32 %v789_v28  ;;  %v746_v32 = vsub.f32 %v1748_v52, %v698_v45  ;;  %v791_v47 = vmul.f32 1.442695, %v745_v30 }
 0x23a   :  { %v1850_v34 = vpop.eup %1296  ;;  %1310 = vpow2.f32 %v787_v25  ;;  %v700_v36 = vpop.xlane.xlu0 %699 }
 0x23b   :  { %v1852_v38 = vpop.eup %1298  ;;  %v793_v19 = vmul.f32 1.442695, %v746_v32  ;;  %v747_v40 = vsub.f32 %v1752_v54, %v700_v36  ;;  %841 = vadd.xlane.f32.xlu1 %v1850_v34 }
 0x23c   :  { %839 = vadd.xlane.f32.xlu0 %v1852_v38  ;;  %v702_v50 = vpop.xlane.xlu1 %701 }
 0x23d   :  { %1312 = vpow2.f32 %v793_v19  ;;  %v748_v42 = vsub.f32 %v1756_v56, %v702_v50  ;;  %v795_v52 = vmul.f32 1.442695, %v747_v40 }
 0x23e   :  { %v1858_v44 = vpop.eup %1300  ;;  %1314 = vpow2.f32 %v791_v47  ;;  %v704_v21 = vpop.xlane.xlu0 %703 }
 0x23f   :  { %v1860_v46 = vpop.eup %1302  ;;  %v797_v48 = vmul.f32 1.442695, %v748_v42  ;;  %v749_v51 = vsub.f32 %v1760_v58, %v704_v21  ;;  %845 = vadd.xlane.f32.xlu1 %v1858_v44 }
 0x240   :  { %843 = vadd.xlane.f32.xlu0 %v1860_v46  ;;  %v706_v54 = vpop.xlane.xlu1 %705 }
 0x241   :  { %1316 = vpow2.f32 %v797_v48  ;;  %v750_v24 = vsub.f32 %v1764_v60, %v706_v54  ;;  %v799_v56 = vmul.f32 1.442695, %v749_v51 }
 0x242   :  { %v1866_v49 = vpop.eup %1304  ;;  %1318 = vpow2.f32 %v795_v52  ;;  %v708_v53 = vpop.xlane.xlu0 %707 }
 0x243   :  { %v1868_v55 = vpop.eup %1306  ;;  %v801_v27 = vmul.f32 1.442695, %v750_v24  ;;  %v751_v59 = vsub.f32 %v1768_v62, %v708_v53  ;;  %849 = vadd.xlane.f32.xlu1 %v1866_v49 }
 0x244   :  { %847 = vadd.xlane.f32.xlu0 %v1868_v55  ;;  %v710_v58 = vpop.xlane.xlu1 %709 }
 0x245   :  { %1320 = vpow2.f32 %v801_v27  ;;  %v752_v61 = vsub.f32 %v1772_v0, %v710_v58  ;;  %v803_v60 = vmul.f32 1.442695, %v751_v59 }
 0x246   :  { %v1874_v29 = vpop.eup %1308  ;;  %1322 = vpow2.f32 %v799_v56  ;;  %v712_v31 = vpop.xlane.xlu0 %711 }
 0x247   :  { %v1876_v63 = vpop.eup %1310  ;;  %v805_v33 = vmul.f32 1.442695, %v752_v61  ;;  %v753_v3 = vsub.f32 %v1776_v2, %v712_v31  ;;  %853 = vadd.xlane.f32.xlu1 %v1874_v29 }
 0x248   :  { %851 = vadd.xlane.f32.xlu0 %v1876_v63  ;;  %v714_v62 = vpop.xlane.xlu1 %713 }
 0x249   :  { %1324 = vpow2.f32 %v805_v33  ;;  %v754_v5 = vsub.f32 %v1780_v4, %v714_v62  ;;  %v807_v0 = vmul.f32 1.442695, %v753_v3 }
 0x24a   :  { %v1882_v7 = vpop.eup %1312  ;;  %1326 = vpow2.f32 %v803_v60  ;;  %v716_v37 = vpop.xlane.xlu0 %715 }
 0x24b   :  { %v1884_v9 = vpop.eup %1314  ;;  %v809_v39 = vmul.f32 1.442695, %v754_v5  ;;  %v755_v13 = vsub.f32 %v1784_v6, %v716_v37  ;;  %857 = vadd.xlane.f32.xlu1 %v1882_v7 }
 0x24c   :  { %855 = vadd.xlane.f32.xlu0 %v1884_v9  ;;  %v718_v2 = vpop.xlane.xlu1 %717 }
 0x24d   :  { %1328 = vpow2.f32 %v809_v39  ;;  %v756_v15 = vsub.f32 %v1788_v8, %v718_v2  ;;  %v811_v4 = vmul.f32 1.442695, %v755_v13 }
 0x24e   :  { %v1890_v17 = vpop.eup %1316  ;;  %1330 = vpow2.f32 %v807_v0  ;;  %v720_v22 = vpop.xlane.xlu0 %719 }
 0x24f   :  { %v1892_v41 = vpop.eup %1318  ;;  %v813_v25 = vmul.f32 1.442695, %v756_v15  ;;  %v757_v26 = vsub.f32 %v1792_v10, %v720_v22  ;;  %861 = vadd.xlane.f32.xlu1 %v1890_v17 }
 0x250   :  { %859 = vadd.xlane.f32.xlu0 %v1892_v41  ;;  %v722_v6 = vpop.xlane.xlu1 %721 }
 0x251   :  { %1332 = vpow2.f32 %v813_v25  ;;  %v758_v28 = vsub.f32 %v1796_v12, %v722_v6  ;;  %v815_v8 = vmul.f32 1.442695, %v757_v26 }
 0x252   :  { %v1898_v30 = vpop.eup %1320  ;;  %1334 = vpow2.f32 %v811_v4  ;;  %v724_v45 = vpop.xlane.xlu0 %723 }
 0x253   :  { %v1900_v32 = vpop.eup %1322  ;;  %v817_v47 = vmul.f32 1.442695, %v758_v28  ;;  %v759_v36 = vsub.f32 %v1800_v14, %v724_v45  ;;  %865 = vadd.xlane.f32.xlu1 %v1898_v30 }
 0x254   :  { %863 = vadd.xlane.f32.xlu0 %v1900_v32  ;;  %v726_v10 = vpop.xlane.xlu1 %725 }
 0x255   :  { %1336 = vpow2.f32 %v817_v47  ;;  %v760_v19 = vsub.f32 %v1804_v16, %v726_v10  ;;  %v819_v12 = vmul.f32 1.442695, %v759_v36 }
 0x256   :  { %v1906_v40 = vpop.eup %1324  ;;  %1338 = vpow2.f32 %v815_v8  ;;  %v728_v50 = vpop.xlane.xlu0 %727 }
 0x257   :  { %v1908_v42 = vpop.eup %1326  ;;  %v821_v52 = vmul.f32 1.442695, %v760_v19  ;;  %v761_v21 = vsub.f32 %v1808_v18, %v728_v50  ;;  %869 = vadd.xlane.f32.xlu1 %v1906_v40 }
 0x258   :  { %867 = vadd.xlane.f32.xlu0 %v1908_v42  ;;  %v730_v14 = vpop.xlane.xlu1 %729 }
 0x259   :  { %1340 = vpow2.f32 %v821_v52  ;;  %v762_v48 = vsub.f32 %v1812_v20, %v730_v14  ;;  %v823_v16 = vmul.f32 1.442695, %v761_v21 }
 0x25a   :  { %v1914_v51 = vpop.eup %1328  ;;  %1342 = vpow2.f32 %v819_v12 }
 0x25b   :  { %v1916_v54 = vpop.eup %1330  ;;  %v825_v24 = vmul.f32 1.442695, %v762_v48  ;;  %873 = vadd.xlane.f32.xlu1 %v1914_v51 }
 0x25c   :  { %871 = vadd.xlane.f32.xlu0 %v1916_v54 }
 0x25d   :  { %1344 = vpow2.f32 %v825_v24 }
 0x25e   :  { %v1920_v18 = vpop.eup %1332  ;;  %1346 = vpow2.f32 %v823_v16 }
 0x25f   :  { %v1922_v56 = vpop.eup %1334  ;;  %877 = vadd.xlane.f32.xlu1 %v1920_v18 }
 0x260   :  { %875 = vadd.xlane.f32.xlu0 %v1922_v56 }
 0x262   :  { %v1926_v20 = vpop.eup %1336 }
 0x263   :  { %v1928_v53 = vpop.eup %1338  ;;  %881 = vadd.xlane.f32.xlu1 %v1926_v20 }
 0x264   :  { %879 = vadd.xlane.f32.xlu0 %v1928_v53 }
 0x266   :  { %v1932_v27 = vpop.eup %1340 }
 0x267   :  { %v1934_v59 = vpop.eup %1342  ;;  %885 = vadd.xlane.f32.xlu1 %v1932_v27 }
 0x268   :  { %883 = vadd.xlane.f32.xlu0 %v1934_v59 }
 0x26a   :  { %v1938_v58 = vpop.eup %1344 }
 0x26b   :  { %v1940_v61 = vpop.eup %1346  ;;  %889 = vadd.xlane.f32.xlu1 %v1938_v58 }
 0x26c   :  { %887 = vadd.xlane.f32.xlu0 %v1940_v61 }
 0x2b4   :  { %v830_v60 = vpop.xlane.xlu1 %829 }
 0x2b5   :  { %1348 = vrcp.f32 %v830_v60 }
 0x2b8   :  { %v834_v31 = vpop.xlane.xlu1 %833 }
 0x2b9   :  { %1350 = vrcp.f32 %v834_v31  ;;  %v828_v33 = vpop.xlane.xlu0 %827 }
 0x2ba   :  { %1352 = vrcp.f32 %v828_v33 }
 0x2bd   :  { %v832_v3 = vpop.xlane.xlu0 %831 }
 0x2be   :  { %1354 = vrcp.f32 %v832_v3 }
 0x2c0   :  { %v838_v62 = vpop.xlane.xlu1 %837 }
 0x2c1   :  { %1356 = vrcp.f32 %v838_v62  ;;  %v836_v5 = vpop.xlane.xlu0 %835 }
 0x2c2   :  { %v1349_v0 = vpop.eup %1348  ;;  %1358 = vrcp.f32 %v836_v5 }
 0x2c3   :  { %v894_v37 = vmul.f32 %v1349_v0, %v1824_v57 }
 0x2c4   :  { %v842_v39 = vpop.xlane.xlu1 %841 }
 0x2c5   :  { %956 = vst [vmem:[#allocation2 + $0x8] sm:$0xff] %v894_v37  ;;  %1360 = vrcp.f32 %v842_v39  ;;  %v840_v13 = vpop.xlane.xlu0 %839 }
 0x2c6   :  { %v1351_v2 = vpop.eup %1350  ;;  %1362 = vrcp.f32 %v840_v13 }
 0x2c7   :  { %v1353_v15 = vpop.eup %1352  ;;  %v898_v4 = vmul.f32 %v1351_v2, %v1829_v1 }
 0x2c8   :  { %v892_v22 = vmul.f32 %v1353_v15, %v1831_v35  ;;  %v846_v25 = vpop.xlane.xlu1 %845 }
 0x2c9   :  { %958 = vst [vmem:[#allocation2 + $0x18] sm:$0xff] %v898_v4  ;;  %1364 = vrcp.f32 %v846_v25  ;;  %v844_v26 = vpop.xlane.xlu0 %843 }
 0x2ca   :  { %955 = vst [vmem:[#allocation2] sm:$0xff] %v892_v22  ;;  %1366 = vrcp.f32 %v844_v26 }
 0x2cb   :  { %v1355_v6 = vpop.eup %1354 }
 0x2cc   :  { %v896_v57 = vmul.f32 %v1355_v6, %v1837_v11  ;;  %v850_v28 = vpop.xlane.xlu1 %849 }
 0x2cd   :  { %1368 = vrcp.f32 %v850_v28  ;;  %v848_v8 = vpop.xlane.xlu0 %847 }
 0x2ce   :  { %v1357_v45 = vpop.eup %1356  ;;  %957 = vst [vmem:[#allocation2 + $0x10] sm:$0xff] %v896_v57  ;;  %1370 = vrcp.f32 %v848_v8 }
 0x2cf   :  { %v1359_v47 = vpop.eup %1358  ;;  %v902_v1 = vmul.f32 %v1357_v45, %v1842_v23 }
 0x2d0   :  { %v900_v35 = vmul.f32 %v1359_v47, %v1844_v43  ;;  %v854_v36 = vpop.xlane.xlu1 %853 }
 0x2d1   :  { %960 = vst [vmem:[#allocation2 + $0x28] sm:$0xff] %v902_v1  ;;  %1372 = vrcp.f32 %v854_v36  ;;  %v852_v10 = vpop.xlane.xlu0 %851 }
 0x2d2   :  { %v1361_v19 = vpop.eup %1360  ;;  %959 = vst [vmem:[#allocation2 + $0x20] sm:$0xff] %v900_v35  ;;  %1374 = vrcp.f32 %v852_v10 }
 0x2d3   :  { %v1363_v12 = vpop.eup %1362  ;;  %v906_v11 = vmul.f32 %v1361_v19, %v1850_v34 }
 0x2d4   :  { %v904_v50 = vmul.f32 %v1363_v12, %v1852_v38  ;;  %v858_v52 = vpop.xlane.xlu1 %857 }
 0x2d5   :  { %962 = vst [vmem:[#allocation2 + $0x38] sm:$0xff] %v906_v11  ;;  %1376 = vrcp.f32 %v858_v52  ;;  %v856_v21 = vpop.xlane.xlu0 %855 }
 0x2d6   :  { %v1365_v14 = vpop.eup %1364  ;;  %961 = vst [vmem:[#allocation2 + $0x30] sm:$0xff] %v904_v50  ;;  %1378 = vrcp.f32 %v856_v21 }
 0x2d7   :  { %v1367_v23 = vpop.eup %1366  ;;  %v910_v43 = vmul.f32 %v1365_v14, %v1858_v44 }
 0x2d8   :  { %v908_v48 = vmul.f32 %v1367_v23, %v1860_v46  ;;  %v862_v16 = vpop.xlane.xlu1 %861 }
 0x2d9   :  { %964 = vst [vmem:[#allocation2 + $0x48] sm:$0xff] %v910_v43  ;;  %1380 = vrcp.f32 %v862_v16  ;;  %v860_v24 = vpop.xlane.xlu0 %859 }
 0x2da   :  { %v1369_v60 = vpop.eup %1368  ;;  %963 = vst [vmem:[#allocation2 + $0x40] sm:$0xff] %v908_v48  ;;  %1382 = vrcp.f32 %v860_v24 }
 0x2db   :  { %v1371_v34 = vpop.eup %1370  ;;  %v914_v38 = vmul.f32 %v1369_v60, %v1866_v49 }
 0x2dc   :  { %v912_v31 = vmul.f32 %v1371_v34, %v1868_v55  ;;  %v866_v33 = vpop.xlane.xlu1 %865 }
 0x2dd   :  { %966 = vst [vmem:[#allocation2 + $0x58] sm:$0xff] %v914_v38  ;;  %1384 = vrcp.f32 %v866_v33  ;;  %v864_v3 = vpop.xlane.xlu0 %863 }
 0x2de   :  { %v1373_v62 = vpop.eup %1372  ;;  %965 = vst [vmem:[#allocation2 + $0x50] sm:$0xff] %v912_v31  ;;  %1386 = vrcp.f32 %v864_v3 }
 0x2df   :  { %v1375_v44 = vpop.eup %1374  ;;  %v918_v46 = vmul.f32 %v1373_v62, %v1874_v29 }
 0x2e0   :  { %v916_v5 = vmul.f32 %v1375_v44, %v1876_v63  ;;  %v870_v0 = vpop.xlane.xlu1 %869 }
 0x2e1   :  { %968 = vst [vmem:[#allocation2 + $0x68] sm:$0xff] %v918_v46  ;;  %1388 = vrcp.f32 %v870_v0  ;;  %v868_v37 = vpop.xlane.xlu0 %867 }
 0x2e2   :  { %v1377_v39 = vpop.eup %1376  ;;  %967 = vst [vmem:[#allocation2 + $0x60] sm:$0xff] %v916_v5  ;;  %1390 = vrcp.f32 %v868_v37 }
 0x2e3   :  { %v1379_v49 = vpop.eup %1378  ;;  %v922_v55 = vmul.f32 %v1377_v39, %v1882_v7 }
 0x2e4   :  { %v920_v13 = vmul.f32 %v1379_v49, %v1884_v9  ;;  %v874_v2 = vpop.xlane.xlu1 %873 }
 0x2e5   :  { %970 = vst [vmem:[#allocation2 + $0x78] sm:$0xff] %v922_v55  ;;  %1392 = vrcp.f32 %v874_v2  ;;  %v872_v15 = vpop.xlane.xlu0 %871 }
 0x2e6   :  { %v1381_v4 = vpop.eup %1380  ;;  %969 = vst [vmem:[#allocation2 + $0x70] sm:$0xff] %v920_v13  ;;  %1394 = vrcp.f32 %v872_v15 }
 0x2e7   :  { %v1383_v29 = vpop.eup %1382  ;;  %v926_v63 = vmul.f32 %v1381_v4, %v1890_v17 }
 0x2e8   :  { %v924_v22 = vmul.f32 %v1383_v29, %v1892_v41  ;;  %v878_v25 = vpop.xlane.xlu1 %877 }
 0x2e9   :  { %972 = vst [vmem:[#allocation2 + $0x88] sm:$0xff] %v926_v63  ;;  %1396 = vrcp.f32 %v878_v25  ;;  %v876_v26 = vpop.xlane.xlu0 %875 }
 0x2ea   :  { %v1385_v6 = vpop.eup %1384  ;;  %971 = vst [vmem:[#allocation2 + $0x80] sm:$0xff] %v924_v22  ;;  %1398 = vrcp.f32 %v876_v26 }
 0x2eb   :  { %v1387_v7 = vpop.eup %1386  ;;  %v930_v9 = vmul.f32 %v1385_v6, %v1898_v30 }
 0x2ec   :  { %v928_v57 = vmul.f32 %v1387_v7, %v1900_v32  ;;  %v882_v28 = vpop.xlane.xlu1 %881 }
 0x2ed   :  { %974 = vst [vmem:[#allocation2 + $0x98] sm:$0xff] %v930_v9  ;;  %1400 = vrcp.f32 %v882_v28  ;;  %v880_v8 = vpop.xlane.xlu0 %879 }
 0x2ee   :  { %v1389_v45 = vpop.eup %1388  ;;  %973 = vst [vmem:[#allocation2 + $0x90] sm:$0xff] %v928_v57  ;;  %1402 = vrcp.f32 %v880_v8 }
 0x2ef   :  { %v1391_v17 = vpop.eup %1390  ;;  %v934_v41 = vmul.f32 %v1389_v45, %v1906_v40 }
 0x2f0   :  { %v932_v47 = vmul.f32 %v1391_v17, %v1908_v42  ;;  %v886_v1 = vpop.xlane.xlu1 %885 }
 0x2f1   :  { %976 = vst [vmem:[#allocation2 + $0xa8] sm:$0xff] %v934_v41  ;;  %1404 = vrcp.f32 %v886_v1  ;;  %v884_v35 = vpop.xlane.xlu0 %883 }
 0x2f2   :  { %v1393_v36 = vpop.eup %1392  ;;  %975 = vst [vmem:[#allocation2 + $0xa0] sm:$0xff] %v932_v47  ;;  %1406 = vrcp.f32 %v884_v35 }
 0x2f3   :  { %v1395_v30 = vpop.eup %1394  ;;  %v938_v32 = vmul.f32 %v1393_v36, %v1914_v51 }
 0x2f4   :  { %v936_v10 = vmul.f32 %v1395_v30, %v1916_v54  ;;  %v890_v19 = vpop.xlane.xlu1 %889 }
 0x2f5   :  { %978 = vst [vmem:[#allocation2 + $0xb8] sm:$0xff] %v938_v32  ;;  %1408 = vrcp.f32 %v890_v19  ;;  %v888_v12 = vpop.xlane.xlu0 %887 }
 0x2f6   :  { %v1397_v11 = vpop.eup %1396  ;;  %977 = vst [vmem:[#allocation2 + $0xb0] sm:$0xff] %v936_v10  ;;  %1410 = vrcp.f32 %v888_v12 }
 0x2f7   :  { %v1399_v40 = vpop.eup %1398  ;;  %v942_v42 = vmul.f32 %v1397_v11, %v1920_v18 }
 0x2f8   :  { %v940_v50 = vmul.f32 %v1399_v40, %v1922_v56 }
 0x2f9   :  { %980 = vst [vmem:[#allocation2 + $0xc8] sm:$0xff] %v942_v42 }
 0x2fa   :  { %v1401_v52 = vpop.eup %1400  ;;  %979 = vst [vmem:[#allocation2 + $0xc0] sm:$0xff] %v940_v50 }
 0x2fb   :  { %v1403_v21 = vpop.eup %1402  ;;  %v946_v51 = vmul.f32 %v1401_v52, %v1926_v20 }
 0x2fc   :  { %v944_v54 = vmul.f32 %v1403_v21, %v1928_v53 }
 0x2fd   :  { %982 = vst [vmem:[#allocation2 + $0xd8] sm:$0xff] %v946_v51 }
 0x2fe   :  { %v1405_v14 = vpop.eup %1404  ;;  %981 = vst [vmem:[#allocation2 + $0xd0] sm:$0xff] %v944_v54 }
 0x2ff   :  { %v1407_v23 = vpop.eup %1406  ;;  %v950_v43 = vmul.f32 %v1405_v14, %v1932_v27 }
 0x300   :  { %v948_v48 = vmul.f32 %v1407_v23, %v1934_v59 }
 0x301   :  { %984 = vst [vmem:[#allocation2 + $0xe8] sm:$0xff] %v950_v43 }
 0x302   :  { %v1409_v18 = vpop.eup %1408  ;;  %983 = vst [vmem:[#allocation2 + $0xe0] sm:$0xff] %v948_v48 }
 0x303   :  { %v1411_v56 = vpop.eup %1410  ;;  %v954_v16 = vmul.f32 %v1409_v18, %v1938_v58 }
 0x304   :  { %v952_v20 = vmul.f32 %v1411_v56, %v1940_v61 }
 0x305   :  { %986 = vst [vmem:[#allocation2 + $0xf8] sm:$0xff] %v954_v16 }
 0x306   :  { %985 = vst [vmem:[#allocation2 + $0xf0] sm:$0xff] %v952_v20 }
 0x307   :  { %1423 = shalt.err (!%p1420_p4)
}
 0x308   :  { %s1435_s15 = smov 128   ;;  %s1436_s16 = smov 8  }
 0x309   :  { %998 = dma.vmem_to_hbm [thread:$0]  %s993_s4, 4096, %s1984_s5, [#allocation3], %s1435_s15, %s1435_s15, %s1436_s16  }
 0x30a   :  { %1432 = dma.done.wait [#allocation3], 4096  }
 0x30b   :  { %1433 = vsyncadd [#allocation3], 4294963200 }
 0x30c   :  { %1002 = vsyncpa [#allocation3], 1 }

</bundles_post_ra>
